<compile_context>
chip_gen: v5e
topology: v5e:2x2
jax: 0.10.0
libtpu: 0.0.40
codegen_flags: <defaults>
</compile_context>

<pallas_src>
import numpy as np
import jax
import jax.numpy as jnp
from jax import lax
from jax.experimental import pallas as pl
from jax.experimental.pallas import tpu as pltpu


# ----------------------------------------------------------------------------
# Deterministic parameter / operator construction (numpy, float64)
# ----------------------------------------------------------------------------
def gaussian_kernel1d(kernel_size: int, sigma: float) -> np.ndarray:
    """Normalized 1-D Gaussian (matches kornia get_gaussian_kernel1d)."""
    x = np.arange(kernel_size, dtype=np.float64) - kernel_size // 2
    if kernel_size % 2 == 0:
        x = x + 0.5
    g = np.exp(-(x ** 2) / (2.0 * sigma ** 2))
    return g / g.sum()


def _nearest_indices(out_size: int, in_size: int) -> np.ndarray:
    # Integer arithmetic: exact floor(i * in/out), PyTorch 'nearest' source index.
    return (np.arange(out_size, dtype=np.int64) * in_size) // out_size


def _reflect(j: int, n: int) -> int:
    # 'reflect' padding index map (edge not repeated); valid for -(n-1) <= j <= 2n-2.
    if j < 0:
        return -j
    if j >= n:
        return 2 * (n - 1) - j
    return j


def _fused_axis_operator(out_size: int, in_size: int, w1d: np.ndarray) -> np.ndarray:
    """(out_size, in_size) operator: Gaussian-blur(reflect pad) o nearest-upsample."""
    k_len = int(w1d.shape[0])
    pad = (k_len - 1) // 2
    assert pad < out_size, (
        f"reflect padding requires pad ({pad}) < upsampled size ({out_size})")
    up_idx = _nearest_indices(out_size, in_size)
    op = np.zeros((out_size, in_size), dtype=np.float64)
    for i in range(out_size):
        for k in range(k_len):
            src = _reflect(i - pad + k, out_size)
            op[i, up_idx[src]] += w1d[k]
    return op


def _round_up(x: int, m: int) -> int:
    return ((x + m - 1) // m) * m


def _tpu_vmem_info():
    """(physical_vmem_bytes, per-kernel budget for double-buffered blocks + scratch)."""
    cap = 128 * 1024 * 1024
    try:
        info = pltpu.get_tpu_info()
        cap = int(getattr(info, "vmem_capacity_bytes", cap))
    except Exception:
        pass
    # Stay well under physical VMEM; v7x only has 64 MiB per TensorCore.
    budget = min(cap // 2, 48 * 1024 * 1024)
    return cap, budget


# ----------------------------------------------------------------------------
# Pallas kernel: out[b] = A_v @ (x[b] @ A_h^T)
#   Stage 1: one batched MXU matmul per grid step into a VMEM scratch.
#   Stage 2: per-image MXU matmul via lax.fori_loop (bounded vreg live ranges).
# ----------------------------------------------------------------------------
def _make_fused_kernel(tb: int, h_in_pad: int, w_in_pad: int):
    def kernel(a_v_ref, a_ht_ref, x_ref, o_ref, t_ref):
        # Stage 1: (tb*h_in_pad, w_in_pad) @ (w_in_pad, W) -> scratch.
        # Flatten is a free view: trailing dims are (8,128)-aligned.
        x_flat = x_ref[...].reshape(tb * h_in_pad, w_in_pad)
        t_ref[...] = jnp.dot(x_flat, a_ht_ref[...],
                             preferred_element_type=jnp.float32)

        a_v = a_v_ref[...]                      # (H, h_in_pad), grid-invariant

        # Stage 2: per-image A_v @ t_b.
        def body(b, carry):
            start = pl.multiple_of(b * h_in_pad, h_in_pad)
            t_b = t_ref[pl.ds(start, h_in_pad), :]
            o_ref[b] = jnp.dot(a_v, t_b,
                               preferred_element_type=jnp.float32
                               ).astype(o_ref.dtype)
            return carry

        lax.fori_loop(0, tb, body, 0)
    return kernel


# ----------------------------------------------------------------------------
# Module wrapper
# ----------------------------------------------------------------------------
class AnomalyMapGenerator:
    """JAX/Pallas port of the anomalib PatchCore AnomalyMapGenerator."""

    _MAX_IMAGES_PER_BLOCK = 32

    def __init__(self, input_size, sigma: int = 4):
        self.input_size = (int(input_size[0]), int(input_size[1]))
        self.sigma = float(sigma)
        self.kernel_size = 2 * int(4.0 * sigma + 0.5) + 1   # 33 for sigma=4
        self.pad = (self.kernel_size - 1) // 2
        self.w1d = gaussian_kernel1d(self.kernel_size, self.sigma)   # float64
        self._op_cache = {}

    # -- fused linear operators with (8,128)-aligned K dims --------------------
    def _operators(self, h_in: int, w_in: int):
        key = (h_in, w_in)
        if key not in self._op_cache:
            H, W = self.input_size
            h_in_pad = _round_up(h_in, 8)
            w_in_pad = _round_up(w_in, 128)
            a_v = _fused_axis_operator(H, h_in, self.w1d)        # (H, h_in)
            a_h = _fused_axis_operator(W, w_in, self.w1d)        # (W, w_in)
            a_v_p = np.zeros((H, h_in_pad), dtype=np.float32)    # zero K padding
            a_v_p[:, :h_in] = a_v
            a_ht_p = np.zeros((w_in_pad, W), dtype=np.float32)   # zero K padding
            a_ht_p[:w_in, :] = a_h.T
            self._op_cache[key] = (jnp.asarray(a_v_p), jnp.asarray(a_ht_p))
        return self._op_cache[key]

    # -- honest VMEM accounting (padded VMEM layouts, double buffering) --------
    def _vmem_block_bytes(self, tb: int, h_in_pad: int, w_in_pad: int) -> int:
        H, W = self.input_size
        f32 = 4
        h_sub = _round_up(H, 8)
        w_lane = _round_up(W, 128)
        in_blk = tb * h_in_pad * w_in_pad * f32
        out_blk = tb * h_sub * w_lane * f32                      # VMEM layout of output block
        a_v_blk = h_sub * _round_up(h_in_pad, 128) * f32
        a_ht_blk = _round_up(w_in_pad, 8) * w_lane * f32
        scratch = tb * h_in_pad * w_lane * f32
        # the pipeline double-buffers every in/out block
        return 2 * (in_blk + out_blk + a_v_blk + a_ht_blk) + scratch

    def _choose_tb(self, batch: int, h_in_pad: int, w_in_pad: int,
                   budget: int) -> int:
        # Largest tb that fits the VMEM budget.
        tb_budget = 1
        for tb in range(1, self._MAX_IMAGES_PER_BLOCK + 1):
            if self._vmem_block_bytes(tb, h_in_pad, w_in_pad) <= budget:
                tb_budget = tb
            else:
                break
        tb_cap = tb_budget
        if batch >= 2:
            # Guarantee >= 2 grid steps so the "parallel" batch axis can shard
            # across v7x's two TensorCores (harmless on v5e/v6e).
            tb_cap = min(tb_cap, pl.cdiv(batch, 2))
        tb_cap = max(1, min(tb_cap, batch))

        # Minimize padded work + per-step overhead (~10% of one image's cost);
        # prefers tb that divides batch over rounding b_pad up.
        best_tb, best_cost = 1, None
        for tb in range(1, tb_cap + 1):
            b_pad = _round_up(batch, tb)
            cost = b_pad + 0.1 * (b_pad // tb)
            if (best_cost is None or cost < best_cost - 1e-9
                    or (abs(cost - best_cost) <= 1e-9 and tb > best_tb)):
                best_tb, best_cost = tb, cost
        return best_tb

    # -- forward ----------------------------------------------------------------
    def __call__(self, patch_scores: jnp.ndarray) -> jnp.ndarray:
        # patch_scores: [B, 1, h_patch, w_patch]  (NCHW)
        batch, channels, h_in, w_in = patch_scores.shape
        assert channels == 1, "GaussianBlur2d is configured with channels=1"
        H, W = self.input_size
        assert self.pad < H and self.pad < W, "reflect pad must be < output size"

        h_in_pad = _round_up(h_in, 8)
        w_in_pad = _round_up(w_in, 128)

        a_v, a_ht = self._operators(h_in, w_in)

        cap, budget = _tpu_vmem_info()
        tb = self._choose_tb(batch, h_in_pad, w_in_pad, budget)
        b_pad = _round_up(batch, tb)

        x = patch_scores[:, 0].astype(jnp.float32)              # (B, h_in, w_in)
        pads = ((0, b_pad - batch), (0, h_in_pad - h_in), (0, w_in_pad - w_in))
        if any(p[1] for p in pads):
            x = jnp.pad(x, pads)                                 # zeros: numerically exact

        est = self._vmem_block_bytes(tb, h_in_pad, w_in_pad)
        vmem_limit = int(min(int(0.9 * cap), max(budget, (est * 5) // 4)))

        out = pl.pallas_call(
            _make_fused_kernel(tb, h_in_pad, w_in_pad),
            out_shape=jax.ShapeDtypeStruct((b_pad, H, W), jnp.float32),
            grid_spec=pltpu.PrefetchScalarGridSpec(
                num_scalar_prefetch=0,
                grid=(b_pad // tb,),
                in_specs=[
                    pl.BlockSpec((H, h_in_pad), lambda g: (0, 0)),        # A_v
                    pl.BlockSpec((w_in_pad, W), lambda g: (0, 0)),        # A_h^T
                    pl.BlockSpec((tb, h_in_pad, w_in_pad),                # patch scores
                                 lambda g: (g, 0, 0)),
                ],
                # Unpadded full-dim spatial block: no post-kernel crop round trip.
                out_specs=pl.BlockSpec((tb, H, W), lambda g: (g, 0, 0)),
                scratch_shapes=[pltpu.VMEM((tb * h_in_pad, W), jnp.float32)],
            ),
            compiler_params=pltpu.CompilerParams(
                dimension_semantics=("parallel",),
                vmem_limit_bytes=vmem_limit),
        )(a_v, a_ht, x)

        if b_pad != batch:
            out = out[:batch]
        return out[:, None, :, :]                                # restore channel axis


# ----------------------------------------------------------------------------
# Pure-numpy float64 reference of the original pipeline
# (nearest upsample + reflect pad + separable Gaussian conv)
# ----------------------------------------------------------------------------
def reference_numpy(gen: AnomalyMapGenerator, x: np.ndarray) -> np.ndarray:
    H, W = gen.input_size
    k_len, pad, w1d = gen.kernel_size, gen.pad, gen.w1d
    ri = _nearest_indices(H, x.shape[1])
    ci = _nearest_indices(W, x.shape[2])
    up = x[:, ri][:, :, ci]
    padded = np.pad(up, ((0, 0), (pad, pad), (pad, pad)), mode="reflect")
    acc_h = np.zeros((x.shape[0], H + 2 * pad, W), dtype=np.float64)
    for k in range(k_len):
        acc_h += w1d[k] * padded[:, :, k:k + W]
    acc = np.zeros((x.shape[0], H, W), dtype=np.float64)
    for k in range(k_len):
        acc += w1d[k] * acc_h[:, k:k + H, :]
    return acc


# ----------------------------------------------------------------------------
if __name__ == "__main__":
    key = jax.random.PRNGKey(0)
    k1, k2 = jax.random.split(key)

    # Case 1: aligned output dims (H % 8 == 0), small patch grid.
    ps1 = jax.random.uniform(k1, (2, 1, 8, 8), dtype=jnp.float32)
    gen1 = AnomalyMapGenerator(input_size=(32, 32), sigma=4)
    out1 = jax.block_until_ready(gen1(ps1))
    assert out1.shape == (2, 1, 32, 32)
    ref1 = reference_numpy(gen1, np.asarray(ps1, dtype=np.float64)[:, 0])
    np.testing.assert_allclose(np.asarray(out1)[:, 0], ref1, rtol=1e-4, atol=1e-4)

    # Case 2: non-aligned output dims and odd batch (exercises padding paths).
    ps2 = jax.random.uniform(k2, (3, 1, 7, 9), dtype=jnp.float32)
    gen2 = AnomalyMapGenerator(input_size=(30, 34), sigma=4)
    out2 = jax.block_until_ready(gen2(ps2))
    assert out2.shape == (3, 1, 30, 34)
    ref2 = reference_numpy(gen2, np.asarray(ps2, dtype=np.float64)[:, 0])
    np.testing.assert_allclose(np.asarray(out2)[:, 0], ref2, rtol=1e-4, atol=1e-4)

    print("KERNEL_OK")
</pallas_src>

<mosaic_0001>
module attributes {stable_mosaic.version = 11 : i64} {
  func.func @kernel(%arg0: i32, %arg1: memref<32x8xf32, #tpu.memory_space<vmem>>, %arg2: memref<128x32xf32, #tpu.memory_space<vmem>>, %arg3: memref<1x8x128xf32, #tpu.memory_space<vmem>>, %arg4: memref<1x32x32xf32, #tpu.memory_space<vmem>>, %arg5: memref<8x32xf32, #tpu.memory_space<vmem>>) attributes {dimension_semantics = [#tpu.dimension_semantics<parallel>], iteration_bounds = array<i64: 2>, scalar_prefetch = 0 : i64, scratch_operands = 1 : i64, tpu.core_type = #tpu.core_type<tc>, window_params = [{pipeline_mode = #tpu.pipeline_mode<synchronous>, transform_indices = @transform_0, window_bounds = array<i64: 32, 8>}, {pipeline_mode = #tpu.pipeline_mode<synchronous>, transform_indices = @transform_1, window_bounds = array<i64: 128, 32>}, {transform_indices = @transform_2, window_bounds = array<i64: 1, 8, 128>}, {transform_indices = @transform_3, window_bounds = array<i64: 1, 32, 32>}]} {
    %c0 = arith.constant 0 : index
    %c0_0 = arith.constant 0 : index
    %c0_1 = arith.constant 0 : index
    %0 = vector.load %arg3[%c0, %c0_0, %c0_1] : memref<1x8x128xf32, #tpu.memory_space<vmem>>, vector<1x8x128xf32>
    %1 = vector.shape_cast %0 : vector<1x8x128xf32> to vector<8x128xf32>
    %c0_2 = arith.constant 0 : index
    %c0_3 = arith.constant 0 : index
    %2 = vector.load %arg2[%c0_2, %c0_3] : memref<128x32xf32, #tpu.memory_space<vmem>>, vector<128x32xf32>
    %cst = arith.constant dense<0.000000e+00> : vector<8x32xf32>
    %3 = tpu.matmul %1, %2, %cst {dimension_numbers = #tpu.dot_dimension_numbers<[1], [0], [0], [1], [0, 0, 1, 1], [], []>} : vector<8x128xf32>, vector<128x32xf32>, vector<8x32xf32> -> vector<8x32xf32>
    %c0_4 = arith.constant 0 : index
    %c0_5 = arith.constant 0 : index
    %4 = vector.load %arg5[%c0_4, %c0_5] : memref<8x32xf32, #tpu.memory_space<vmem>>, vector<8x32xf32>
    tpu.vector_store %arg5[%c0_4, %c0_5], %3 {strides = array<i32>} : memref<8x32xf32, #tpu.memory_space<vmem>>, vector<8x32xf32>,
    %c0_6 = arith.constant 0 : index
    %c0_7 = arith.constant 0 : index
    %5 = vector.load %arg1[%c0_6, %c0_7] : memref<32x8xf32, #tpu.memory_space<vmem>>, vector<32x8xf32>
    %c0_i32 = arith.constant 0 : i32
    %c8_i32 = arith.constant 8 : i32
    %6 = arith.muli %c0_i32, %c8_i32 : i32
    %7 = tpu.assume_multiple %6, 8 : i32
    %8 = arith.index_cast %7 : i32 to index
    %c0_8 = arith.constant 0 : index
    %9 = vector.load %arg5[%8, %c0_8] : memref<8x32xf32, #tpu.memory_space<vmem>>, vector<8x32xf32>
    %cst_9 = arith.constant dense<0.000000e+00> : vector<32x32xf32>
    %10 = tpu.matmul %5, %9, %cst_9 {dimension_numbers = #tpu.dot_dimension_numbers<[1], [0], [0], [1], [0, 0, 1, 1], [], []>} : vector<32x8xf32>, vector<8x32xf32>, vector<32x32xf32> -> vector<32x32xf32>
    %11 = arith.index_cast %c0_i32 : i32 to index
    %c0_10 = arith.constant 0 : index
    %c0_11 = arith.constant 0 : index
    %12 = vector.load %arg4[%11, %c0_10, %c0_11] : memref<1x32x32xf32, #tpu.memory_space<vmem>>, vector<1x32x32xf32>
    %13 = vector.shape_cast %12 : vector<1x32x32xf32> to vector<32x32xf32>
    %14 = vector.shape_cast %10 : vector<32x32xf32> to vector<1x32x32xf32>
    tpu.vector_store %arg4[%11, %c0_10, %c0_11], %14 {strides = array<i32>} : memref<1x32x32xf32, #tpu.memory_space<vmem>>, vector<1x32x32xf32>,
    %c1_i32 = arith.constant 1 : i32
    return
  }
  func.func @transform_0(%arg0: i32) -> (i32, i32) {
    %c0_i32 = arith.constant 0 : i32
    %c0_i32_0 = arith.constant 0 : i32
    %c0_i32_1 = arith.constant 0 : i32
    return %c0_i32, %c0_i32_0 : i32, i32
  }
  func.func @transform_1(%arg0: i32) -> (i32, i32) {
    %c0_i32 = arith.constant 0 : i32
    %c0_i32_0 = arith.constant 0 : i32
    %c0_i32_1 = arith.constant 0 : i32
    return %c0_i32, %c0_i32_0 : i32, i32
  }
  func.func @transform_2(%arg0: i32) -> (i32, i32, i32) {
    %c0_i32 = arith.constant 0 : i32
    %c0_i32_0 = arith.constant 0 : i32
    %c0_i32_1 = arith.constant 0 : i32
    return %arg0, %c0_i32, %c0_i32_0 : i32, i32, i32
  }
  func.func @transform_3(%arg0: i32) -> (i32, i32, i32) {
    %c0_i32 = arith.constant 0 : i32
    %c0_i32_0 = arith.constant 0 : i32
    %c0_i32_1 = arith.constant 0 : i32
    return %arg0, %c0_i32, %c0_i32_0 : i32, i32, i32
  }
}

</mosaic_0001>

<bundles_post_ra>
// kernel: tpu_custom_call.1
= control target key start
LH: loop header
LB: loop body
LE: loop exit
PB: predicated region body
PF: predicated region fallthrough
CT: control target
= control target key end

     0   :  { %8 = vsyncpa [#allocation4], 0  ;;  %s627_s0 = inlined_call_operand.vmem [shape: f32[32,8], index: 0, kind: input, shape index: {}]   ;;  %s628_s1 = inlined_call_operand.vmem [shape: f32[128,32], index: 1, kind: input, shape index: {}]   ;;  %s629_s2 = inlined_call_operand.vmem [shape: f32[2,8,128], index: 2, kind: input, shape index: {}]   ;;  %s630_s3 = inlined_call_operand.hbm [shape: f32[2,32,32], index: 3, kind: output, shape index: {}]  }
   0x1   :  { %10 = vsyncpa [#allocation4 + $0x1], 0  ;;  %s477_s12 = smov 0   ;;  %s479_s13 = smov 0  }
   0x2   :  { %s481_s14 = smov 0   ;;  %s483_s15 = smov 0  }
   0x3 LB: > { %s498_s16 = sadd.s32 4294967295, %s453_s15   ;;  %s334_s17 = sadd.s32 4294967294, %s453_s15   ;;  %s453_s15 = sphi %s483_s15, %s636_s15   ;;  %s449_s14 = sphi %s481_s14, %s635_s14   ;;  %s445_s13 = sphi %s479_s13, %s634_s13   ;;  %s441_s12 = sphi %s477_s12, %s633_s12  }
   0x4   : > { %s502_s18 = sadd.s32 1, %s453_s15   ;;  %s91_s19 = sadd.s32 1, %s449_s14 }
   0x5   : > { %s88_s20 = ssub.s32 %s453_s15, %s502_s18  ;;  %p101_p0 = scmp.ne.s32.totalorder %s449_s14, %s445_s13 }
   0x6   : > { %p89_p1 = scmp.eq.s32.totalorder %s88_s20, 0  ;;  %p102_p2 = scmp.eq.s32.totalorder %s498_s16, 1 }
   0x7   : > { %p107_p3 = scmp.ne.s32.totalorder %s445_s13, %s441_s12  ;;  %p108_p4 = scmp.eq.s32.totalorder %s334_s17, 1 }
   0x8   : > { %s513_s21 = scalar_select %p89_p1, %s449_s14, %s91_s19  }
   0x9   : > { %p515_p5 = por %p102_p2, %p101_p0  ;;  %p519_p6 = por %p108_p4, %p107_p3 }
   0xa   : > { %p337_p7 = scmp.ge.s32.totalorder %s453_s15, 1  ;;  %p139_p8 = scmp.lt.s32.totalorder %s453_s15, 3 }
   0xc   : > { %p140_p9 = pnand %p337_p7, %p139_p8 }
   0xd   : > { %p162_p10 = scmp.lt.s32.totalorder (!%p140_p9), %s498_s16, 1  ;;  %s349_s9 = sshll.u32 (!%p140_p9), %s498_s16, 5 }
   0xe   : > { %143 = sbr.rel (%p140_p9) target bundleno = 340 (0x154), region = 32  ;;  %s268_s17 = scalar_lea.hbm (!%p140_p9), %s630_s3, %s349_s9 }
   0xf   : > { %s271_s20 = sshll.u32 (!%p140_p9), %s268_s17, 4  ;;  %s272_s20 = int_to_ptr.hbm [resolvable:$true] %s271_s20 }
  0x10   : > { %s405_s25 = sshra.s32 (!%p140_p9), %s272_s20, 4  ;;  %s406_s25 = int_to_ptr.hbm [resolvable:$true] %s405_s25 }
  0x11   : > { %s407_s26 = scalar_lea.hbm (!%p140_p9), %s406_s25, 32  ;;  %p412_p0 = scmp.lt.s32.totalorder (!%p140_p9), %s406_s25, %s630_s3 }
  0x12   : > { %p408_p11 = scmp.ne.s32.totalorder (!%p140_p9), %s406_s25, %s407_s26 }
  0x13   : > { %v182_v0 = vld [vmem:[%s628_s1 + $0x78] sm:$0xff]  ;;  %v181_v1 = vld [vmem:[%s628_s1 + $0x70] sm:$0xff]  ;;  %v180_v2 = vld [vmem:[%s628_s1 + $0x68] sm:$0xff]  ;;  %s163_s28 = scalar_select %p162_p10, %s498_s16, 1  ;;  %vm203_vm0 = vcmask 261120   ;;  %vm210_vm1 = vcmask 64512  }
  0x14   : > { %183 = vmatpush.msra.mxu0 %v182_v0  ;;  %v179_v3 = vld [vmem:[%s628_s1 + $0x60] sm:$0xff]  ;;  %v178_v4 = vld [vmem:[%s628_s1 + $0x58] sm:$0xff]  ;;  %v177_v5 = vld [vmem:[%s628_s1 + $0x50] sm:$0xff]  ;;  %p409_p12 = pnand %p408_p11, %p515_p5 }
  0x15   : > { %v176_v6 = vld [vmem:[%s628_s1 + $0x48] sm:$0xff]  ;;  %v175_v7 = vld [vmem:[%s628_s1 + $0x40] sm:$0xff]  ;;  %v174_v8 = vld [vmem:[%s628_s1 + $0x38] sm:$0xff]  ;;  %s339_s6 = sshll.u32 %s163_s28, 3  ;;  %s411_s28 = scalar_lea.hbm %s630_s3, 64 }
  0x16   : > { %184 = vmatpush.msra.mxu0 %v181_v1  ;;  %v173_v9 = vld [vmem:[%s628_s1 + $0x30] sm:$0xff]  ;;  %v172_v10 = vld [vmem:[%s628_s1 + $0x28] sm:$0xff]  ;;  %v171_v11 = vld [vmem:[%s628_s1 + $0x20] sm:$0xff]  ;;  %s165_s19 = scalar_lea.vmem %s629_s2, %s339_s6  ;;  %s159_s6 = sand.u32 1, %s445_s13  }
  0x17   : > { %v170_v12 = vld [vmem:[%s628_s1 + $0x18] sm:$0xff]  ;;  %v169_v13 = vld [vmem:[%s628_s1 + $0x10] sm:$0xff]  ;;  %v168_v14 = vld [vmem:[%s628_s1 + $0x8] sm:$0xff]  ;;  %s338_s7 = sshll.u32 %s159_s6, 5  ;;  %s257_s24 = scalar_lea.sflag [#allocation4], %s159_s6 }
  0x18   : > { %185 = vmatpush.msra.mxu0 %v180_v2  ;;  %v167_v15 = vld [vmem:[%s628_s1] sm:$0xff]  ;;  %v206_v20 = vld [vmem:[%s627_s0 + $0x8] sm:$0xff]  ;;  %v207_v21 = vld [vmem:[%s627_s0 + $0x10] sm:$0xff]  ;;  %s161_s8 = scalar_lea.vmem [#allocation3], %s338_s7  ;;  %p410_p13 = pneg %p409_p12 }
  0x19   : > { %v166_v16 = vld [vmem:[%s165_s19] sm:$0xff]  ;;  %v208_v22 = vld [vmem:[%s627_s0 + $0x18] sm:$0xff]  ;;  %s269_s19 = sshll.u32 %s161_s8, 4  ;;  %p413_p1 = scmp.lt.s32.totalorder %s411_s28, %s407_s26  ;;  %s270_s19 = int_to_ptr.vmem [resolvable:$true] %s269_s19 }
  0x1a   : > { %186 = vmatpush.msra.mxu0 %v179_v3  ;;  %v205_v18 = vld [vmem:[%s627_s0] sm:$0xff] }
  0x1b   : > { %p414_p2 = por %p413_p1, %p412_p0 }
  0x1c   : > { %187 = vmatpush.msra.mxu0 %v178_v4 }
  0x1d   : > { %p415_p3 = pnand %p414_p2, %p410_p13 }
  0x1e   : > { %188 = vmatpush.msra.mxu0 %v177_v5 }
  0x20   : > { %189 = vmatpush.msra.mxu0 %v176_v6 }
  0x22   : > { %190 = vmatpush.msra.mxu0 %v175_v7 }
  0x24   : > { %191 = vmatpush.msra.mxu0 %v174_v8 }
  0x26   : > { %192 = vmatpush.msra.mxu0 %v173_v9 }
  0x28   : > { %193 = vmatpush.msra.mxu0 %v172_v10 }
  0x2a   : > { %194 = vmatpush.msra.mxu0 %v171_v11 }
  0x2c   : > { %195 = vmatpush.msra.mxu0 %v170_v12 }
  0x2e   : > { %196 = vmatpush.msra.mxu0 %v169_v13 }
  0x30   : > { %197 = vmatpush.msra.mxu0 %v168_v14 }
  0x32   : > { %198 = vmatpush.msra.mxu0 %v167_v15 }
  0x33   : > { %199 = vmatmul.f32.vlgmr.msra.gmra.mxu0 %v166_v16 }
  0xb0   : > { %v200_v17 = vpop.f32.mrf.mxu0 }
  0xb1   : > { %204 = vst.msk [vmem:[#allocation2] sm:$0xff] %vm203_vm0, %v200_v17 }
  0xb8   : > { %v209_v19 = vld [vmem:[#allocation2] sm:$0xff] }
  0xb9   : > { %238 = vmatpush.msra.mxu1 %v209_v19 }
  0xba   : > { %340 = vmatmul.msk.f32.vlgmr.msra.gmra.mxu1 %vm210_vm1, %v205_v18 }
  0xc2   : > { %341 = vmatmul.msk.f32.gmra.mxu1 %vm210_vm1, %v206_v20 }
  0xca   : > { %342 = vmatmul.msk.f32.gmra.mxu1 %vm210_vm1, %v207_v21 }
  0xd2   : > { %343 = vmatmul.msk.f32.gmra.mxu1 %vm210_vm1, %v208_v22 }
 0x137   : > { %v240_v23 = vpop.f32.mrf.mxu1 }
 0x138   : > { %252 = vst.msk [vmem:[%s161_s8] sm:$0xff] %vm203_vm0, %v240_v23 }
 0x13f   : > { %v243_v24 = vpop.f32.mrf.mxu1 }
 0x140   : > { %253 = vst.msk [vmem:[%s161_s8 + $0x8] sm:$0xff] %vm203_vm0, %v243_v24 }
 0x147   : > { %v246_v25 = vpop.f32.mrf.mxu1 }
 0x148   : > { %254 = vst.msk [vmem:[%s161_s8 + $0x10] sm:$0xff] %vm203_vm0, %v246_v25 }
 0x14f   : > { %v249_v26 = vpop.f32.mrf.mxu1 }
 0x150   : > { %255 = vst.msk [vmem:[%s161_s8 + $0x18] sm:$0xff] %vm203_vm0, %v249_v26 }
 0x151   : > { %418 = shalt.err (!%p415_p3)
}
 0x152   : > { %s455_s4 = smov 128   ;;  %s456_s5 = smov 8  }
 0x153   : > { %350 = dma.vmem_to_hbm [thread:$0]  (%p515_p5), %s270_s19, 512, %s272_s20, %s257_s24, %s455_s4, %s455_s4, %s456_s5  }
 0x154 PF: > { %p356_p4 = scmp.ge.s32.totalorder %s453_s15, 2  ;;  %s286_s6 = sand.u32 1, %s441_s12  }
 0x155   : > { %s287_s7 = scalar_lea.sflag [#allocation4], %s286_s6 }
 0x156   : > { %p353_p7 = pnand %p356_p4, %p519_p6 }
 0x158   : > { %p354_p8 = pneg %p353_p7 }
 0x15a   : > { %436 = dma.done.wait (%p354_p8), %s287_s7, 512  }
 0x15b   : > { %438 = vsyncadd (%p354_p8), %s287_s7, 4294966784  ;;  %p13_p9 = scmp.ge.s32.totalorder %s502_s18, 4   ;;  %s633_s12 = smov %s445_s13 }
 0x15c   : > { %s634_s13 = smov %s449_s14  ;;  %s635_s14 = smov %s513_s21 }
 0x15d   : > { %s636_s15 = smov %s502_s18  ;;  %15 = sbr.rel (!%p13_p9) target bundleno = 3 (0x3), region = 67 }
 0x162   :  { %293 = vsyncpa [#allocation4], 1 }
 0x163   :  { %295 = vsyncpa [#allocation4 + $0x1], 1 }

</bundles_post_ra>
